<compile_context>
chip_gen: v7x
topology: tpu7x:2x2x1
jax: 0.10.0
libtpu: 0.0.40
codegen_flags: <defaults>
</compile_context>

<pallas_src>
import math
import functools

import jax
import jax.numpy as jnp
from jax.experimental import pallas as pl
from jax.experimental.pallas import tpu as pltpu


def _ppe_add_kernel(x_ref, pe_ref, out_ref):
    # x_ref:   (tb, tn)  VMEM
    # pe_ref:  (1,  tn)  VMEM  (sublane-broadcast over the batch/row axis)
    # out_ref: (tb, tn)  VMEM
    out_ref[...] = (x_ref[...] + pe_ref[...]).astype(out_ref.dtype)


def make_periodic_pe(max_seq_len, d_model, dtype=jnp.float32):
    """pe[p, 2k] = sin(p*w_k), pe[p, 2k+1] = cos(p*w_k), w_k = exp(-2k*ln(1e4)/d)."""
    if d_model % 2 != 0:
        raise ValueError("d_model must be even")
    position = jnp.arange(max_seq_len, dtype=jnp.float32)[:, None]            # (L, 1)
    div_term = jnp.exp(
        jnp.arange(0, d_model, 2, dtype=jnp.float32) * -(math.log(10000.0) / d_model)
    )                                                                          # (d/2,)
    ang = position * div_term                                                  # (L, d/2)
    pe = jnp.stack([jnp.sin(ang), jnp.cos(ang)], axis=-1).reshape(max_seq_len, d_model)
    return pe.astype(dtype)


def prepare_pe(pe, seq_len, dtype):
    """Hoistable per-(seq_len, dtype) prep: slice, cast, flatten -> (1, seq_len*d)."""
    max_seq_len, d_model = pe.shape
    if seq_len > max_seq_len:
        raise ValueError(
            f"sequence length {seq_len} exceeds max_seq_len {max_seq_len}"
        )
    return pe[:seq_len].astype(dtype).reshape(1, seq_len * d_model)


@functools.partial(jax.jit, static_argnames=("tb_max",))
def _ppe_apply(x, pe_flat, *, tb_max=256):
    """x: (B, L, D); pe_flat: (1, L*D) already in x.dtype.  Returns x + pe."""
    B, L, D = x.shape
    N = L * D
    assert pe_flat.shape == (1, N)

    # Flatten trailing dims -> lane-dense column axis (contiguous reshape, free).
    x2 = x.reshape(B, N)

    # --- tile selection ------------------------------------------------------
    itemsize = jnp.dtype(x.dtype).itemsize
    # Lane tile sized so the x block is ~2 MiB at tb=256 regardless of dtype
    # (f32 -> 2048, bf16 -> 4096, int8/fp8 -> 8192 lanes), always a 128-multiple.
    tn_max = max(128, ((2 * 1024 * 1024) // (256 * itemsize)) // 128 * 128)

    tb = B if B <= tb_max else tb_max            # full extent or 256-row tiles
    tn = N if N <= tn_max else tn_max            # full extent (always legal) or
                                                 # 128-multiple (ragged edge masked)
    grid_b = pl.cdiv(B, tb)
    grid_n = pl.cdiv(N, tn)

    # v7x: make sure there are >=2 grid steps on a "parallel" axis so both
    # TensorCores get work.  Harmless on 1-TC chips (v5e/v6e).
    if grid_b * grid_n < 2 and N > 128:
        tn = max(128, ((N // 2) // 128) * 128)   # ~half of N, 128-multiple
        grid_n = pl.cdiv(N, tn)
    # (If N <= 128 with large B the grid may stay (1,1); splitting the sublane
    #  axis below 8 rows is not worth the layout cost for such tiny inputs.)

    # --- pallas call ----------------------------------------------------------
    # Grid order: column axis outer, batch axis inner -> pe's block index is
    # constant across consecutive steps, so its tile is not re-fetched.
    out = pl.pallas_call(
        _ppe_add_kernel,
        out_shape=jax.ShapeDtypeStruct((B, N), x.dtype),
        grid_spec=pltpu.PrefetchScalarGridSpec(
            num_scalar_prefetch=0,
            grid=(grid_n, grid_b),
            in_specs=[
                pl.BlockSpec((tb, tn), lambda n, b: (b, n)),   # x
                pl.BlockSpec((1, tn), lambda n, b: (0, n)),    # pe (batch-invariant)
            ],
            out_specs=pl.BlockSpec((tb, tn), lambda n, b: (b, n)),
        ),
        compiler_params=pltpu.CompilerParams(
            dimension_semantics=("parallel", "parallel"),
        ),
    )(x2, pe_flat)

    return out.reshape(B, L, D)


def periodic_positional_encoding(x, pe):
    """Convenience wrapper: x (B, L, D), pe (max_seq_len, d_model)."""
    B, L, D = x.shape
    pe_flat = prepare_pe(pe, L, x.dtype)
    return _ppe_apply(x, pe_flat)


if __name__ == "__main__":
    key = jax.random.PRNGKey(0)

    batch, seq, d_model = 2, 8, 32
    max_seq_len = 64

    pe = make_periodic_pe(max_seq_len, d_model)
    x = jax.random.normal(key, (batch, seq, d_model), dtype=jnp.float32)

    out = periodic_positional_encoding(x, pe)
    out = jax.block_until_ready(out)

    # Pure-JAX reference matching the PyTorch forward (dropout p=0.0 -> identity).
    ref = x + pe[None, :seq, :]
    assert out.shape == (batch, seq, d_model), out.shape
    assert jnp.allclose(out, ref, atol=1e-6, rtol=1e-6), float(
        jnp.max(jnp.abs(out - ref))
    )

    print("KERNEL_OK")
</pallas_src>

<mosaic_0001>
module attributes {stable_mosaic.version = 11 : i64} {
  func.func @_ppe_add_kernel(%arg0: i32, %arg1: i32, %arg2: memref<2x128xf32, #tpu.memory_space<vmem>>, %arg3: memref<1x128xf32, #tpu.memory_space<vmem>>, %arg4: memref<2x128xf32, #tpu.memory_space<vmem>>) attributes {dimension_semantics = [#tpu.dimension_semantics<parallel>, #tpu.dimension_semantics<parallel>], iteration_bounds = array<i64: 2, 1>, scalar_prefetch = 0 : i64, scratch_operands = 0 : i64, tpu.core_type = #tpu.core_type<tc>, window_params = [{transform_indices = @transform_0, window_bounds = array<i64: 2, 128>}, {transform_indices = @transform_1, window_bounds = array<i64: 1, 128>}, {transform_indices = @transform_2, window_bounds = array<i64: 2, 128>}]} {
    %c0 = arith.constant 0 : index
    %c0_0 = arith.constant 0 : index
    %0 = vector.load %arg2[%c0, %c0_0] : memref<2x128xf32, #tpu.memory_space<vmem>>, vector<2x128xf32>
    %c0_1 = arith.constant 0 : index
    %c0_2 = arith.constant 0 : index
    %1 = vector.load %arg3[%c0_1, %c0_2] : memref<1x128xf32, #tpu.memory_space<vmem>>, vector<1x128xf32>
    %2 = vector.broadcast %1 : vector<1x128xf32> to vector<2x128xf32>
    %3 = arith.addf %0, %2 : vector<2x128xf32>
    %c0_3 = arith.constant 0 : index
    %c0_4 = arith.constant 0 : index
    %4 = vector.load %arg4[%c0_3, %c0_4] : memref<2x128xf32, #tpu.memory_space<vmem>>, vector<2x128xf32>
    tpu.vector_store %arg4[%c0_3, %c0_4], %3 {strides = array<i32>} : memref<2x128xf32, #tpu.memory_space<vmem>>, vector<2x128xf32>,
    return
  }
  func.func @transform_0(%arg0: i32, %arg1: i32) -> (i32, i32) {
    %c0_i32 = arith.constant 0 : i32
    return %arg1, %arg0 : i32, i32
  }
  func.func @transform_1(%arg0: i32, %arg1: i32) -> (i32, i32) {
    %c0_i32 = arith.constant 0 : i32
    %c0_i32_0 = arith.constant 0 : i32
    return %c0_i32, %arg0 : i32, i32
  }
  func.func @transform_2(%arg0: i32, %arg1: i32) -> (i32, i32) {
    %c0_i32 = arith.constant 0 : i32
    return %arg1, %arg0 : i32, i32
  }
}

</mosaic_0001>

<bundles_post_ra>
// kernel: _ppe_apply.1
= control target key start
LH: loop header
LB: loop body
LE: loop exit
PB: predicated region body
PF: predicated region fallthrough
CT: control target
= control target key end

     0   :  { %s364_s9 = smov 0   ;;  %s366_s10 = smov 0   ;;  %s383_s0 = inlined_call_operand.vmem [shape: f32[2,256], index: 0, kind: input, shape index: {}]   ;;  %s384_s1 = inlined_call_operand.vmem [shape: f32[1,256], index: 1, kind: input, shape index: {}]   ;;  %s385_s2 = inlined_call_operand.vmem [shape: f32[2,256], index: 2, kind: output, shape index: {}]  }
   0x1   :  { %s345_s11 = smov 0  }
   0x2 LB: > { %s24_s12 = sadd.s32 1, %s343_s10  ;;  %p295_p0 = scmp.ge.s32.totalorder %s347_s11, 1  ;;  %s347_s11 = sphi %s345_s11, %s12_s11   ;;  %s343_s10 = sphi %s366_s10, %s387_s10   ;;  %s339_s9 = sphi %s364_s9, %s386_s9  }
   0x3   : > { %p26_p1 = scmp.ge.s32.totalorder %s24_s12, 2  ;;  %p139_p2 = scmp.lt.s32.totalorder %s347_s11, 3 }
   0x5   : > { %s389_s12 = smov (%p26_p1, %s24_s12), 0  ;;  %p140_p3 = pnand %p295_p0, %p139_p2 }
   0x6   : > { %p172_p4 = scmp.lt.s32.totalorder (!%p140_p3), %s339_s9, 1 }
   0x7   : > { %143 = sbr.rel (%p140_p3) target bundleno = 21 (0x15), region = 28 }
   0xe   : > { %s391_s9 = smov (!%p172_p4, %s339_s9), 1 }
   0xf   : > { %s296_s13 = sshll.u32 %s391_s9, 1  ;;  %s180_s16 = scalar_lea.vmem %s384_s1, %s391_s9 }
  0x10   : > { %s177_s19 = scalar_lea.vmem %s383_s0, %s296_s13  ;;  %v298_v0 = vld [vmem:[%s180_s16] ss:$0 sm:$0xff]  ;;  %s188_s22 = scalar_lea.vmem %s385_s2, %s296_s13 }
  0x11   : > { %v189_v1 = vld [vmem:[%s177_s19] sm:$0x3] }
  0x12   : > { %v197_v2 = vadd.f32 %v298_v0, %v189_v1 }
  0x14   : > { %198 = vst [vmem:[%s188_s22] sm:$0x3] %v197_v2 }
  0x15 PF: > { %s12_s11 = sadd.s32 1, %s347_s11   ;;  %s386_s9 = smov %s343_s10 }
  0x16   : > { %p9_p5 = scmp.ge.s32.totalorder %s12_s11, 4   ;;  %s387_s10 = smov %s389_s12 }
  0x18   :  { %11 = sbr.rel (!%p9_p5) target bundleno = 2 (0x2), region = 61 }

</bundles_post_ra>
